<compile_context>
chip_gen: v7x
topology: tpu7x:2x2x1
jax: 0.10.0
libtpu: 0.0.40
codegen_flags: <defaults>
</compile_context>

<pallas_src>
from collections import defaultdict

import numpy as np
import jax
import jax.numpy as jnp
from jax import lax
from jax.experimental import pallas as pl
from jax.experimental.pallas import tpu as pltpu


NBUF = 4  # kernel-2 manual pipeline depth (lookahead of NBUF - 1 nodes)


def _vmem_capacity_bytes():
    try:
        return int(pltpu.get_tpu_info().vmem_capacity_bytes)
    except Exception:
        return 64 * 1024 * 1024  # conservative (v7x-sized) fallback


# --------------------------------------------------------------------------
# Kernel 1: per-node mean over SEED neighbors of max(entail, contradict).
# Row-tiled + BlockSpec-pipelined; inputs are the sublane-dense (N, 8, N/8)
# views also consumed by kernel 2 (no separate 2-D copy of the matrices).
# --------------------------------------------------------------------------
def _score_kernel(e_ref, c_ref, a_ref, seed_ref, avg_ref, cnt_ref):
    e = e_ref[...]                         # (tm, 8, L)
    c = c_ref[...]
    a = a_ref[...]
    s = seed_ref[...]                      # (8, L) -> broadcast over rows
    w = a * s                              # edge exists & neighbor is a seed
    m = jnp.maximum(e, c)
    cnt = jnp.sum(jnp.sum(w, axis=2), axis=1, keepdims=True)        # (tm, 1)
    tot = jnp.sum(jnp.sum(m * w, axis=2), axis=1, keepdims=True)    # (tm, 1)
    avg_ref[...] = tot / jnp.maximum(cnt, 1.0)
    cnt_ref[...] = cnt


def _pick_row_tile(n, vmem_cap):
    """Row tile for kernel 1: generation-aware VMEM budget, >=2 tiles when
    possible (megacore + pipelining), tm | n so no partial blocks exist."""
    if vmem_cap <= 80 * 1024 * 1024:           # v7x: 64 MiB VMEM
        budget, tm_cap = 40 * 1024 * 1024, 256
    else:                                       # v5e / v6e: 128 MiB VMEM
        budget, tm_cap = 96 * 1024 * 1024, 512
    tm = min(tm_cap, budget // (2 * 3 * 4 * max(n, 1)))  # dbl-buffered e/c/a
    tm = min(tm, max(8, n // 4))                # keep >=2 (ideally >=4) tiles
    tm = max(8, (tm // 8) * 8)
    while n % tm:                               # avoid partial (garbage) blocks
        tm -= 8
    return max(tm, 8)


# --------------------------------------------------------------------------
# Shared per-node update (step 3 of the algorithm).  All (8, L) sublane-dense.
# --------------------------------------------------------------------------
def _node_step(t, node, thr, idx, ea, ca, ad, m1_ref, m2_ref, out_ref):
    m1 = m1_ref[...]                       # neighbors currently labeled 1
    m2 = m2_ref[...]                       # neighbors currently labeled 2
    # fused cross-lane reductions (3 instead of 6)
    cnt = jnp.sum(ad * (m1 + m2))
    s1 = jnp.sum(ea * m1 + ca * m2)
    s2 = jnp.sum(ea * m2 + ca * m1)
    inv = 1.0 / jnp.maximum(cnt, 1.0)
    has = cnt > 0.0
    neg_big = jnp.float32(-1e30)
    a1 = jnp.where(has, s1 * inv, neg_big)
    a2 = jnp.where(has, s2 * inv, neg_big)
    # TODO(synk): exact ties between labels 1 and 2 use a fixed 1 > 2 > 0
    # preference; the reference's dict-insertion-order tie-break can differ.
    pick1 = jnp.logical_and(a1 >= a2, a1 >= thr)
    pick2 = jnp.logical_and(jnp.logical_not(pick1), a2 >= thr)
    lab = jnp.where(pick1, jnp.int32(1),
                    jnp.where(pick2, jnp.int32(2), jnp.int32(0)))
    out_ref[t] = lab                       # label emitted in processing order
    hit = (idx == node).astype(jnp.float32)
    m1_ref[...] = m1 + hit * (lab == 1).astype(jnp.float32)
    m2_ref[...] = m2 + hit * (lab == 2).astype(jnp.float32)


# --------------------------------------------------------------------------
# Kernel 2a (fast path): all three matrices resident in VMEM; the serial loop
# has no per-node DMA at all.
# --------------------------------------------------------------------------
def _prop_kernel_vmem(n_proc_ref, order_ref, thr_ref, e_ref, c_ref, a_ref,
                      m1i_ref, m2i_ref, out_ref, m1_ref, m2_ref):
    n_proc = n_proc_ref[0]
    thr = thr_ref[0]
    m1_ref[...] = m1i_ref[...]
    m2_ref[...] = m2i_ref[...]
    sub, lane = m1_ref.shape
    idx = (lax.broadcasted_iota(jnp.int32, (sub, lane), 0) * lane
           + lax.broadcasted_iota(jnp.int32, (sub, lane), 1))

    def body(t, carry):
        node = order_ref[t]
        ad = a_ref[node]                   # (8, L) sublane-dense row
        ea = e_ref[node] * ad
        ca = c_ref[node] * ad
        _node_step(t, node, thr, idx, ea, ca, ad, m1_ref, m2_ref, out_ref)
        return carry

    lax.fori_loop(0, n_proc, body, 0)


# --------------------------------------------------------------------------
# Kernel 2b (HBM path): matrices stay in HBM; 4-slot manual pipeline with the
# next node's prefetch (and all SMEM reads) issued before the DMA waits.
# --------------------------------------------------------------------------
def _prop_kernel_hbm(n_proc_ref, order_ref, thr_ref, e_hbm, c_hbm, a_hbm,
                     m1i_ref, m2i_ref, out_ref,
                     ebuf, cbuf, abuf, sem, m1_ref, m2_ref):
    n_proc = n_proc_ref[0]
    thr = thr_ref[0]
    m1_ref[...] = m1i_ref[...]
    m2_ref[...] = m2i_ref[...]
    sub, lane = m1_ref.shape
    idx = (lax.broadcasted_iota(jnp.int32, (sub, lane), 0) * lane
           + lax.broadcasted_iota(jnp.int32, (sub, lane), 1))

    def fetch(t, slot):
        node = order_ref[t]
        pltpu.make_async_copy(e_hbm.at[node], ebuf.at[slot],
                              sem.at[slot, 0]).start()
        pltpu.make_async_copy(c_hbm.at[node], cbuf.at[slot],
                              sem.at[slot, 1]).start()
        pltpu.make_async_copy(a_hbm.at[node], abuf.at[slot],
                              sem.at[slot, 2]).start()

    # prime the pipeline with the first NBUF-1 nodes of the processing order
    def prime(i, carry):
        fetch(i, i)
        return carry
    lax.fori_loop(0, jnp.minimum(n_proc, NBUF - 1), prime, 0)

    def body(t, carry):
        slot = t % NBUF
        node = order_ref[t]                # SMEM reads issued before any wait
        t_next = t + (NBUF - 1)

        @pl.when(t_next < n_proc)          # prefetch before waiting: the target
        def _():                           # slot only holds consumed data
            fetch(t_next, t_next % NBUF)

        pltpu.make_async_copy(e_hbm.at[0], ebuf.at[slot], sem.at[slot, 0]).wait()
        pltpu.make_async_copy(c_hbm.at[0], cbuf.at[slot], sem.at[slot, 1]).wait()
        pltpu.make_async_copy(a_hbm.at[0], abuf.at[slot], sem.at[slot, 2]).wait()

        ad = abuf[slot]
        ea = ebuf[slot] * ad
        ca = cbuf[slot] * ad
        _node_step(t, node, thr, idx, ea, ca, ad, m1_ref, m2_ref, out_ref)
        return carry

    lax.fori_loop(0, n_proc, body, 0)


# --------------------------------------------------------------------------
# Wrapper (glue: padding, sublane-dense reshape, sorting between kernels).
# --------------------------------------------------------------------------
def sorted_score_consistency_inference(e_mat, c_mat, adj_mat, seed_mask,
                                       init_labels, threshold,
                                       force_hbm_path=False):
    f32 = jnp.float32
    n0 = int(e_mat.shape[0])
    n = (-(-n0 // 8)) * 8                  # pad node count to a multiple of 8
    pad = n - n0

    e_mat = jnp.asarray(e_mat, f32)
    c_mat = jnp.asarray(c_mat, f32)
    adj_mat = jnp.asarray(adj_mat, f32)
    seed_mask = jnp.asarray(seed_mask, jnp.int32)
    init_labels = jnp.asarray(init_labels, jnp.int32)
    if pad:
        e_mat = jnp.pad(e_mat, ((0, pad), (0, pad)))
        c_mat = jnp.pad(c_mat, ((0, pad), (0, pad)))
        adj_mat = jnp.pad(adj_mat, ((0, pad), (0, pad)))
        seed_mask = jnp.pad(seed_mask, (0, pad))
        init_labels = jnp.pad(init_labels, (0, pad))

    L = n // 8
    # Sublane-dense row layout (element j of a row -> sublane j//L, lane j%L).
    # This single reshape replaces the old eca-stack pass; BOTH kernels consume
    # these views, so no other XLA-side bulk data movement remains.
    e3 = e_mat.reshape(n, 8, L)
    c3 = c_mat.reshape(n, 8, L)
    a3 = adj_mat.reshape(n, 8, L)
    seed3 = seed_mask.astype(f32).reshape(8, L)

    vmem_cap = _vmem_capacity_bytes()
    vmem = pltpu.MemorySpace.VMEM
    smem = pltpu.MemorySpace.SMEM

    # ---- kernel 1: row-tiled, pipelined seed-neighbor score reduction ----
    tm = _pick_row_tile(n, vmem_cap)
    grid = (n // tm,)
    limit1 = 2 * 3 * 4 * tm * n + 8 * 1024 * 1024
    limit1 = int(min(max(limit1, 16 * 1024 * 1024),
                     vmem_cap - 16 * 1024 * 1024))
    avg, cnt = pl.pallas_call(
        _score_kernel,
        out_shape=(jax.ShapeDtypeStruct((n, 1), f32),
                   jax.ShapeDtypeStruct((n, 1), f32)),
        grid=grid,
        in_specs=[pl.BlockSpec((tm, 8, L), lambda i: (i, 0, 0)),
                  pl.BlockSpec((tm, 8, L), lambda i: (i, 0, 0)),
                  pl.BlockSpec((tm, 8, L), lambda i: (i, 0, 0)),
                  pl.BlockSpec((8, L), lambda i: (0, 0))],
        out_specs=(pl.BlockSpec((tm, 1), lambda i: (i, 0)),
                   pl.BlockSpec((tm, 1), lambda i: (i, 0))),
        compiler_params=pltpu.CompilerParams(
            dimension_semantics=("parallel",),
            vmem_limit_bytes=limit1),
    )(e3, c3, a3, seed3)
    avg = avg[:, 0]
    cnt = cnt[:, 0]

    # glue: sort processable (non-seed, >=1 seed neighbor) nodes by -score.
    seed_b = seed_mask == 1
    proc_node = jnp.logical_and(jnp.logical_not(seed_b), cnt > 0.0)
    sort_key = jnp.where(proc_node, avg, -jnp.inf)
    order = jnp.argsort(-sort_key).astype(jnp.int32)   # stable, descending
    proc_in_order = proc_node[order]
    n_proc = jnp.sum(proc_node.astype(jnp.int32)).reshape(1)

    init_lab = jnp.where(seed_b, init_labels, 0).astype(jnp.int32)
    m1_init = (init_lab == 1).astype(f32).reshape(8, L)
    m2_init = (init_lab == 2).astype(f32).reshape(8, L)
    thr = jnp.asarray([threshold], dtype=f32)

    slab_bytes = 3 * 4 * n * n
    fast_budget = (44 * 1024 * 1024 if vmem_cap <= 80 * 1024 * 1024
                   else 100 * 1024 * 1024)
    use_vmem_path = (slab_bytes <= fast_budget) and not force_hbm_path

    head_specs = [pl.BlockSpec(memory_space=smem),     # n_proc
                  pl.BlockSpec(memory_space=smem),     # order
                  pl.BlockSpec(memory_space=smem)]     # threshold

    if use_vmem_path:
        limit2 = int(min(vmem_cap - 8 * 1024 * 1024,
                         slab_bytes + 16 * 1024 * 1024))
        order_labels = pl.pallas_call(
            _prop_kernel_vmem,
            out_shape=jax.ShapeDtypeStruct((n,), jnp.int32),
            in_specs=head_specs + [
                pl.BlockSpec(memory_space=vmem),       # entail    (N, 8, L)
                pl.BlockSpec(memory_space=vmem),       # contradict
                pl.BlockSpec(memory_space=vmem),       # adjacency
                pl.BlockSpec(memory_space=vmem),       # m1 init   (8, L)
                pl.BlockSpec(memory_space=vmem)],      # m2 init   (8, L)
            out_specs=pl.BlockSpec(memory_space=smem),
            scratch_shapes=[pltpu.VMEM((8, L), f32),   # m1
                            pltpu.VMEM((8, L), f32)],  # m2
            compiler_params=pltpu.CompilerParams(vmem_limit_bytes=limit2),
        )(n_proc, order, thr, e3, c3, a3, m1_init, m2_init)
    else:
        order_labels = pl.pallas_call(
            _prop_kernel_hbm,
            out_shape=jax.ShapeDtypeStruct((n,), jnp.int32),
            in_specs=head_specs + [
                pl.BlockSpec(memory_space=pl.ANY),     # entail stays in HBM
                pl.BlockSpec(memory_space=pl.ANY),     # contradict
                pl.BlockSpec(memory_space=pl.ANY),     # adjacency
                pl.BlockSpec(memory_space=vmem),       # m1 init
                pl.BlockSpec(memory_space=vmem)],      # m2 init
            out_specs=pl.BlockSpec(memory_space=smem),
            scratch_shapes=[pltpu.VMEM((NBUF, 8, L), f32),   # entail rows
                            pltpu.VMEM((NBUF, 8, L), f32),   # contradict rows
                            pltpu.VMEM((NBUF, 8, L), f32),   # adjacency rows
                            pltpu.SemaphoreType.DMA((NBUF, 3)),
                            pltpu.VMEM((8, L), f32),         # m1
                            pltpu.VMEM((8, L), f32)],        # m2
            compiler_params=pltpu.CompilerParams(
                vmem_limit_bytes=32 * 1024 * 1024),
        )(n_proc, order, thr, e3, c3, a3, m1_init, m2_init)

    # glue: scatter processed labels back to node order; entries past n_proc
    # in order_labels are never read (masked here).
    labels = init_lab.at[order].set(
        jnp.where(proc_in_order, order_labels, init_lab[order]))
    return labels[:n0]


# --------------------------------------------------------------------------
# Pure-python mirror of the PyTorch forward (float input path), for checking.
# --------------------------------------------------------------------------
def _reference_forward(adj_list, threshold, node_labels):
    assert len(node_labels) > 0
    seed_node_labels = dict(node_labels)
    node_labels = dict(node_labels)
    adj = {}
    nodes = set()
    for t_id, p_id, (e_w, c_w) in adj_list:
        nodes.add(t_id)
        nodes.add(p_id)
        if t_id not in adj:
            adj[t_id] = {}
        if p_id not in adj:
            adj[p_id] = {}
        adj[t_id][p_id] = (e_w, c_w)
        adj[p_id][t_id] = (e_w, c_w)

    def flip_tm_stance(s):
        return 2 if s == 1 else (1 if s == 2 else s)

    node_scores = defaultdict(list)
    first_node = None
    for node in adj:
        if node in seed_node_labels:
            continue
        first_node = node
        for other in adj[node]:
            if other not in seed_node_labels:
                continue
            e_w, c_w = adj[node][other]
            node_scores[node].append(max(e_w, c_w))
    assert first_node is not None
    node_avg = {k: float(np.mean(v)) for k, v in node_scores.items()}
    node_list = sorted(node_avg.keys(), key=lambda x: -node_avg[x])
    for node in node_list:
        label_scores = defaultdict(list)
        for other in adj[node]:
            if other in node_labels:
                pred = node_labels[other]
                if pred == 0:
                    continue
                e_w, c_w = adj[node][other]
                label_scores[pred].append(e_w)
                label_scores[flip_tm_stance(pred)].append(c_w)
        label_avg = {l: float(np.mean(s)) for l, s in label_scores.items()}
        label_avg[0] = threshold
        max_label = max(label_avg.items(), key=lambda x: x[1])[0]
        node_labels[node] = max_label
    for nd in nodes:
        if nd not in node_labels:
            node_labels[nd] = 0
    return node_labels


if __name__ == "__main__":
    N = 16
    key = jax.random.PRNGKey(0)

    # deterministic synthetic graph: a ring plus some chords
    edges = []
    seen = set()
    for i in range(N):
        j = (i + 1) % N
        a, b = min(i, j), max(i, j)
        if (a, b) not in seen:
            seen.add((a, b))
            edges.append((a, b))
    for i in range(0, N, 2):
        j = (i + 5) % N
        a, b = min(i, j), max(i, j)
        if a != b and (a, b) not in seen:
            seen.add((a, b))
            edges.append((a, b))

    w_key, _ = jax.random.split(key)
    weights = np.asarray(jax.random.normal(w_key, (len(edges), 2),
                                           dtype=jnp.float32))

    seed_nodes = {0: 1, 4: 2, 8: 0, 12: 1}   # node -> label (0/1/2)
    threshold = 0.05

    E = np.zeros((N, N), np.float32)
    C = np.zeros((N, N), np.float32)
    A = np.zeros((N, N), np.float32)
    adj_list = []
    for idx, (a, b) in enumerate(edges):
        ew = float(weights[idx, 0])
        cw = float(weights[idx, 1])
        E[a, b] = E[b, a] = ew
        C[a, b] = C[b, a] = cw
        A[a, b] = A[b, a] = 1.0
        adj_list.append((f"n{a}", f"n{b}", (ew, cw)))

    seed_mask = np.zeros((N,), np.int32)
    init_labels = np.zeros((N,), np.int32)
    for nid, lab in seed_nodes.items():
        seed_mask[nid] = 1
        init_labels[nid] = lab

    # exercise both the VMEM-resident fast path and the HBM manual-DMA path
    out_fast = sorted_score_consistency_inference(
        jnp.asarray(E), jnp.asarray(C), jnp.asarray(A),
        jnp.asarray(seed_mask), jnp.asarray(init_labels), threshold)
    out_fast = np.asarray(jax.block_until_ready(out_fast))

    out_hbm = sorted_score_consistency_inference(
        jnp.asarray(E), jnp.asarray(C), jnp.asarray(A),
        jnp.asarray(seed_mask), jnp.asarray(init_labels), threshold,
        force_hbm_path=True)
    out_hbm = np.asarray(jax.block_until_ready(out_hbm))

    ref = _reference_forward(adj_list, threshold,
                             {f"n{k}": v for k, v in seed_nodes.items()})
    ref_np = np.array([ref[f"n{i}"] for i in range(N)], np.int32)

    assert np.array_equal(out_fast, ref_np), (out_fast, ref_np)
    assert np.array_equal(out_hbm, ref_np), (out_hbm, ref_np)
    print("KERNEL_OK")
</pallas_src>

<mosaic_0001>
module attributes {stable_mosaic.version = 11 : i64} {
  func.func @_score_kernel(%arg0: i32, %arg1: memref<8x8x2xf32, #tpu.memory_space<vmem>>, %arg2: memref<8x8x2xf32, #tpu.memory_space<vmem>>, %arg3: memref<8x8x2xf32, #tpu.memory_space<vmem>>, %arg4: memref<8x2xf32, #tpu.memory_space<vmem>>, %arg5: memref<8x1xf32, #tpu.memory_space<vmem>>, %arg6: memref<8x1xf32, #tpu.memory_space<vmem>>) attributes {dimension_semantics = [#tpu.dimension_semantics<parallel>], iteration_bounds = array<i64: 2>, scalar_prefetch = 0 : i64, scratch_operands = 0 : i64, tpu.core_type = #tpu.core_type<tc>, window_params = [{transform_indices = @transform_0, window_bounds = array<i64: 8, 8, 2>}, {transform_indices = @transform_1, window_bounds = array<i64: 8, 8, 2>}, {transform_indices = @transform_2, window_bounds = array<i64: 8, 8, 2>}, {pipeline_mode = #tpu.pipeline_mode<synchronous>, transform_indices = @transform_3, window_bounds = array<i64: 8, 2>}, {transform_indices = @transform_4, window_bounds = array<i64: 8, 1>}, {transform_indices = @transform_5, window_bounds = array<i64: 8, 1>}]} {
    %c0 = arith.constant 0 : index
    %c0_0 = arith.constant 0 : index
    %c0_1 = arith.constant 0 : index
    %0 = vector.load %arg1[%c0, %c0_0, %c0_1] : memref<8x8x2xf32, #tpu.memory_space<vmem>>, vector<8x8x2xf32>
    %c0_2 = arith.constant 0 : index
    %c0_3 = arith.constant 0 : index
    %c0_4 = arith.constant 0 : index
    %1 = vector.load %arg2[%c0_2, %c0_3, %c0_4] : memref<8x8x2xf32, #tpu.memory_space<vmem>>, vector<8x8x2xf32>
    %c0_5 = arith.constant 0 : index
    %c0_6 = arith.constant 0 : index
    %c0_7 = arith.constant 0 : index
    %2 = vector.load %arg3[%c0_5, %c0_6, %c0_7] : memref<8x8x2xf32, #tpu.memory_space<vmem>>, vector<8x8x2xf32>
    %c0_8 = arith.constant 0 : index
    %c0_9 = arith.constant 0 : index
    %3 = vector.load %arg4[%c0_8, %c0_9] : memref<8x2xf32, #tpu.memory_space<vmem>>, vector<8x2xf32>
    %4 = vector.shape_cast %3 : vector<8x2xf32> to vector<1x8x2xf32>
    %5 = vector.broadcast %4 : vector<1x8x2xf32> to vector<8x8x2xf32>
    %6 = arith.mulf %2, %5 : vector<8x8x2xf32>
    %7 = arith.maximumf %0, %1 : vector<8x8x2xf32>
    %cst = arith.constant dense<0.000000e+00> : vector<8x8xf32>
    %8 = vector.multi_reduction <add>, %6, %cst [2] : vector<8x8x2xf32> to vector<8x8xf32>
    %cst_10 = arith.constant dense<0.000000e+00> : vector<8xf32>
    %9 = vector.multi_reduction <add>, %8, %cst_10 [1] : vector<8x8xf32> to vector<8xf32>
    %10 = vector.shape_cast %9 : vector<8xf32> to vector<8x1xf32>
    %11 = arith.mulf %7, %6 : vector<8x8x2xf32>
    %cst_11 = arith.constant dense<0.000000e+00> : vector<8x8xf32>
    %12 = vector.multi_reduction <add>, %11, %cst_11 [2] : vector<8x8x2xf32> to vector<8x8xf32>
    %cst_12 = arith.constant dense<0.000000e+00> : vector<8xf32>
    %13 = vector.multi_reduction <add>, %12, %cst_12 [1] : vector<8x8xf32> to vector<8xf32>
    %14 = vector.shape_cast %13 : vector<8xf32> to vector<8x1xf32>
    %cst_13 = arith.constant 1.000000e+00 : f32
    %15 = vector.broadcast %cst_13 : f32 to vector<8x1xf32>
    %16 = arith.maximumf %10, %15 : vector<8x1xf32>
    %17 = arith.divf %14, %16 : vector<8x1xf32>
    %c0_14 = arith.constant 0 : index
    %c0_15 = arith.constant 0 : index
    %18 = vector.load %arg5[%c0_14, %c0_15] : memref<8x1xf32, #tpu.memory_space<vmem>>, vector<8x1xf32>
    tpu.vector_store %arg5[%c0_14, %c0_15], %17 {strides = array<i32>} : memref<8x1xf32, #tpu.memory_space<vmem>>, vector<8x1xf32>,
    %c0_16 = arith.constant 0 : index
    %c0_17 = arith.constant 0 : index
    %19 = vector.load %arg6[%c0_16, %c0_17] : memref<8x1xf32, #tpu.memory_space<vmem>>, vector<8x1xf32>
    tpu.vector_store %arg6[%c0_16, %c0_17], %10 {strides = array<i32>} : memref<8x1xf32, #tpu.memory_space<vmem>>, vector<8x1xf32>,
    return
  }
  func.func @transform_0(%arg0: i32) -> (i32, i32, i32) {
    %c0_i32 = arith.constant 0 : i32
    %c0_i32_0 = arith.constant 0 : i32
    %c0_i32_1 = arith.constant 0 : i32
    return %arg0, %c0_i32, %c0_i32_0 : i32, i32, i32
  }
  func.func @transform_1(%arg0: i32) -> (i32, i32, i32) {
    %c0_i32 = arith.constant 0 : i32
    %c0_i32_0 = arith.constant 0 : i32
    %c0_i32_1 = arith.constant 0 : i32
    return %arg0, %c0_i32, %c0_i32_0 : i32, i32, i32
  }
  func.func @transform_2(%arg0: i32) -> (i32, i32, i32) {
    %c0_i32 = arith.constant 0 : i32
    %c0_i32_0 = arith.constant 0 : i32
    %c0_i32_1 = arith.constant 0 : i32
    return %arg0, %c0_i32, %c0_i32_0 : i32, i32, i32
  }
  func.func @transform_3(%arg0: i32) -> (i32, i32) {
    %c0_i32 = arith.constant 0 : i32
    %c0_i32_0 = arith.constant 0 : i32
    %c0_i32_1 = arith.constant 0 : i32
    return %c0_i32, %c0_i32_0 : i32, i32
  }
  func.func @transform_4(%arg0: i32) -> (i32, i32) {
    %c0_i32 = arith.constant 0 : i32
    %c0_i32_0 = arith.constant 0 : i32
    return %arg0, %c0_i32 : i32, i32
  }
  func.func @transform_5(%arg0: i32) -> (i32, i32) {
    %c0_i32 = arith.constant 0 : i32
    %c0_i32_0 = arith.constant 0 : i32
    return %arg0, %c0_i32 : i32, i32
  }
}

</mosaic_0001>

<bundles_post_ra>
// kernel: tpu_custom_call.1
= control target key start
LH: loop header
LB: loop body
LE: loop exit
PB: predicated region body
PF: predicated region fallthrough
CT: control target
= control target key end

     0   :  { %s667_s18 = smov 0   ;;  %s753_s0 = inlined_call_operand.vmem [shape: f32[16,8,2], index: 0, kind: input, shape index: {}]   ;;  %s754_s1 = inlined_call_operand.vmem [shape: f32[16,8,2], index: 1, kind: input, shape index: {}]   ;;  %s755_s2 = inlined_call_operand.vmem [shape: f32[16,8,2], index: 2, kind: input, shape index: {}]   ;;  %s756_s3 = inlined_call_operand.vmem [shape: f32[8,2], index: 3, kind: input, shape index: {}]   ;;  %s757_s4 = inlined_call_operand.vmem [shape: f32[16,1], index: 4, kind: output, shape index: {0}]   ;;  %s758_s5 = inlined_call_operand.vmem [shape: f32[16,1], index: 5, kind: output, shape index: {1}]  }
   0x1 LB: > { %s673_s19 = sadd.s32 4294967295, %s635_s18   ;;  %p608_p0 = scmp.ge.s32.totalorder %s635_s18, 1  ;;  %s635_s18 = sphi %s667_s18, %s16_s18  }
   0x2   : > { %p213_p1 = scmp.lt.s32.totalorder %s635_s18, 3 }
   0x4   : > { %p214_p2 = pnand %p608_p0, %p213_p1 }
   0x5   : > { %s609_s20 = sshll.u32 (!%p214_p2), %s673_s19, 3  ;;  %v304_v0 = vld [vmem:[%s756_s3] sm:$0xff] (!%p214_p2)  ;;  %vm321_vm0 = vcmask (!%p214_p2), 15360   ;;  %vm388_vm1 = vcmask (!%p214_p2), 1041409   ;;  %vm390_vm2 = vcmask (!%p214_p2), 1042434   ;;  %vm392_vm3 = vcmask (!%p214_p2), 1043459  }
   0x6   : > { %217 = sbr.rel (%p214_p2) target bundleno = 340 (0x154), region = 36  ;;  %p255_p3 = scmp.lt.s32.totalorder (!%p214_p2), %s609_s20, 15  ;;  %vm394_vm4 = vcmask (!%p214_p2), 1044484   ;;  %vm396_vm5 = vcmask (!%p214_p2), 1045509   ;;  %vm398_vm6 = vcmask (!%p214_p2), 1046534   ;;  %vm400_vm7 = vcmask (!%p214_p2), 1047559  }
   0x7   : > { %vm403_vm8 = vcmask (!%p214_p2), 64512   ;;  %p272_p4 = scmp.lt.s32.totalorder (!%p214_p2), %s673_s19, 1  ;;  %vm493_vm9 = vcmask (!%p214_p2), 7168  }
   0xd   : > { %s760_s20 = smov (!%p255_p3, %s609_s20), 15  ;;  %s762_s19 = smov (!%p272_p4, %s673_s19), 1 }
   0xe   : > { %s610_s21 = sshll.u32 %s760_s20, 3  ;;  %s615_s8 = sshll.u32 %s762_s19, 3 }
   0xf   : > { %s270_s26 = scalar_lea.vmem %s755_s2, %s610_s21  ;;  %s687_s29 = scalar_lea.vmem %s753_s0, %s610_s21 }
  0x10   : > { %v298_v1 = vld [vmem:[%s270_s26 + $0x10] sm:$0xff]  ;;  %v296_v2 = vld [vmem:[%s270_s26] sm:$0xff]  ;;  %v299_v3 = vld [vmem:[%s270_s26 + $0x18] sm:$0xff]  ;;  %s694_s7 = scalar_lea.vmem %s754_s1, %s610_s21  ;;  %s279_s11 = scalar_lea.vmem %s758_s5, %s615_s8 }
  0x11   : > { %v307_v4 = vmul.f32 %v304_v0, %v298_v1  ;;  %v305_v5 = vmul.f32 %v304_v0, %v296_v2  ;;  %v308_v6 = vmul.f32 %v304_v0, %v299_v3  ;;  %v297_v7 = vld [vmem:[%s270_s26 + $0x8] sm:$0xff]  ;;  %v300_v10 = vld [vmem:[%s270_s26 + $0x20] sm:$0xff]  ;;  %v303_v17 = vld [vmem:[%s270_s26 + $0x38] sm:$0xff]  ;;  %v354_v1 = vlaneseq  ;;  %s275_s14 = scalar_lea.vmem %s757_s4, %s615_s8 }
  0x12   : > { %v301_v8 = vld [vmem:[%s270_s26 + $0x28] sm:$0xff]  ;;  %v306_v9 = vmul.f32 %v304_v0, %v297_v7  ;;  %v309_v16 = vmul.f32 %v304_v0, %v300_v10  ;;  %v302_v18 = vld [vmem:[%s270_s26 + $0x30] sm:$0xff]  ;;  %v280_v21 = vld [vmem:[%s687_s29] sm:$0xff]  ;;  %v312_v24 = vmul.f32 %v304_v0, %v303_v17 }
  0x13   : > { %v328_v11 = vsel %vm321_vm0, %v307_v4, 0.0  ;;  %v322_v12 = vsel %vm321_vm0, %v305_v5, 0.0  ;;  %v310_v13 = vmul.f32 %v304_v0, %v301_v8  ;;  %v331_v14 = vsel %vm321_vm0, %v308_v6, 0.0  ;;  %v281_v19 = vld [vmem:[%s687_s29 + $0x8] sm:$0xff]  ;;  %v288_v22 = vld [vmem:[%s694_s7] sm:$0xff]  ;;  %v282_v29 = vld [vmem:[%s687_s29 + $0x10] sm:$0xff] }
  0x14   : > { %329 = vadd.xlane.f32.xlu1 %v328_v11  ;;  %323 = vadd.xlane.f32.xlu0 %v322_v12  ;;  %v325_v15 = vsel %vm321_vm0, %v306_v9, 0.0  ;;  %v289_v20 = vld [vmem:[%s694_s7 + $0x8] sm:$0xff]  ;;  %v334_v25 = vsel %vm321_vm0, %v309_v16, 0.0  ;;  %v311_v26 = vmul.f32 %v304_v0, %v302_v18  ;;  %v313_v28 = vmax.f32 %v280_v21, %v288_v22  ;;  %v290_v30 = vld [vmem:[%s694_s7 + $0x10] sm:$0xff]  ;;  %v283_v31 = vld [vmem:[%s687_s29 + $0x18] sm:$0xff] }
  0x15   : > { %v337_v23 = vsel %vm321_vm0, %v310_v13, 0.0  ;;  %v314_v27 = vmax.f32 %v281_v19, %v289_v20  ;;  %v291_v32 = vld [vmem:[%s694_s7 + $0x18] sm:$0xff]  ;;  %v343_v33 = vsel %vm321_vm0, %v312_v24, 0.0  ;;  %v315_v34 = vmax.f32 %v282_v29, %v290_v30  ;;  %v284_v39 = vld [vmem:[%s687_s29 + $0x20] sm:$0xff]  ;;  %v285_v41 = vld [vmem:[%s687_s29 + $0x28] sm:$0xff] }
  0x16   : > { %v340_v35 = vsel %vm321_vm0, %v311_v26, 0.0  ;;  %v407_v37 = vmul.f32 %v313_v28, %v305_v5  ;;  %v316_v38 = vmax.f32 %v283_v31, %v291_v32  ;;  %v292_v40 = vld [vmem:[%s694_s7 + $0x20] sm:$0xff]  ;;  %v293_v42 = vld [vmem:[%s694_s7 + $0x28] sm:$0xff]  ;;  %v286_v49 = vld [vmem:[%s687_s29 + $0x30] sm:$0xff]  ;;  %v355_v2 = vand.u32 127, %v354_v1 }
  0x17   : > { %v408_v36 = vmul.f32 %v314_v27, %v306_v9  ;;  %v409_v43 = vmul.f32 %v315_v34, %v307_v4  ;;  %v317_v44 = vmax.f32 %v284_v39, %v292_v40  ;;  %v318_v48 = vmax.f32 %v285_v41, %v293_v42  ;;  %v294_v50 = vld [vmem:[%s694_s7 + $0x30] sm:$0xff]  ;;  %v287_v51 = vld [vmem:[%s687_s29 + $0x38] sm:$0xff] }
  0x18   : > { %332 = vadd.xlane.f32.xlu1 %v331_v14  ;;  %326 = vadd.xlane.f32.xlu0 %v325_v15  ;;  %v415_v46 = vsel %vm321_vm0, %v407_v37, 0.0  ;;  %v410_v47 = vmul.f32 %v316_v38, %v308_v6  ;;  %v295_v52 = vld [vmem:[%s694_s7 + $0x38] sm:$0xff]  ;;  %v319_v54 = vmax.f32 %v286_v49, %v294_v50  ;;  %v357_v3 = vshrl.u32 %v354_v1, 7 }
  0x19   : > { %v418_v45 = vsel %vm321_vm0, %v408_v36, 0.0  ;;  %v411_v53 = vmul.f32 %v317_v44, %v309_v16  ;;  %v421_v55 = vsel %vm321_vm0, %v409_v43, 0.0  ;;  %v412_v57 = vmul.f32 %v318_v48, %v310_v13 }
  0x1a   : > { %v424_v56 = vsel %vm321_vm0, %v410_v47, 0.0  ;;  %v320_v58 = vmax.f32 %v287_v51, %v295_v52  ;;  %v413_v61 = vmul.f32 %v319_v54, %v311_v26  ;;  %v358_v6 = vsub.s32 %v355_v2, %v357_v3 }
  0x1b   : > { %v427_v59 = vsel %vm321_vm0, %v411_v53, 0.0  ;;  %v430_v60 = vsel %vm321_vm0, %v412_v57, 0.0 }
  0x1c   : > { %338 = vadd.xlane.f32.xlu1 %v337_v23  ;;  %335 = vadd.xlane.f32.xlu0 %v334_v25  ;;  %v414_v62 = vmul.f32 %v320_v58, %v312_v24  ;;  %v433_v63 = vsel %vm321_vm0, %v413_v61, 0.0 }
  0x1e   : > { %v436_v0 = vsel %vm321_vm0, %v414_v62, 0.0 }
  0x20   : > { %344 = vadd.xlane.f32.xlu1 %v343_v33  ;;  %341 = vadd.xlane.f32.xlu0 %v340_v35 }
  0x24   : > { %419 = vadd.xlane.f32.xlu1 %v418_v45  ;;  %416 = vadd.xlane.f32.xlu0 %v415_v46 }
  0x28   : > { %422 = vadd.xlane.f32.xlu0 %v421_v55  ;;  %425 = vadd.xlane.f32.xlu1 %v424_v56 }
  0x2c   : > { %428 = vadd.xlane.f32.xlu0 %v427_v59  ;;  %431 = vadd.xlane.f32.xlu1 %v430_v60 }
  0x30   : > { %434 = vadd.xlane.f32.xlu0 %v433_v63  ;;  %437 = vadd.xlane.f32.xlu1 %v436_v0 }
  0xa1   : > { %v330_v4 = vpop.xlane.xlu1 %329  ;;  %v324_v5 = vpop.xlane.xlu0 %323 }
  0xa2   : > { %v359_v9 = vrot.slane %v324_v5, %v358_v6  ;;  %v367_v12 = vrot.slane %v330_v4, %v358_v6 }
  0xa5   : > { %v333_v7 = vpop.xlane.xlu1 %332  ;;  %v327_v8 = vpop.xlane.xlu0 %326 }
  0xa6   : > { %v371_v10 = vrot.slane %v333_v7, %v358_v6  ;;  %v363_v11 = vrot.slane %v327_v8, %v358_v6 }
  0xa8   : > { %v389_v13 = vsel %vm388_vm1, %v363_v11, %v359_v9 }
  0xa9   : > { %v391_v14 = vsel %vm390_vm2, %v367_v12, %v389_v13  ;;  %v339_v15 = vpop.xlane.xlu1 %338  ;;  %v336_v16 = vpop.xlane.xlu0 %335 }
  0xaa   : > { %v393_v17 = vsel %vm392_vm3, %v371_v10, %v391_v14  ;;  %v375_v18 = vrot.slane %v336_v16, %v358_v6  ;;  %v379_v19 = vrot.slane %v339_v15, %v358_v6 }
  0xac   : > { %v395_v20 = vsel %vm394_vm4, %v375_v18, %v393_v17 }
  0xad   : > { %v345_v21 = vpop.xlane.xlu1 %344  ;;  %v342_v22 = vpop.xlane.xlu0 %341  ;;  %v397_v25 = vsel %vm396_vm5, %v379_v19, %v395_v20 }
  0xae   : > { %v387_v23 = vrot.slane %v345_v21, %v358_v6  ;;  %v383_v24 = vrot.slane %v342_v22, %v358_v6 }
  0xb0   : > { %v399_v26 = vsel %vm398_vm6, %v383_v24, %v397_v25 }
  0xb1   : > { %v420_v27 = vpop.xlane.xlu1 %419  ;;  %v417_v28 = vpop.xlane.xlu0 %416  ;;  %v401_v29 = vsel %vm400_vm7, %v387_v23, %v399_v26 }
  0xb2   : > { %v404_v30 = vsel %vm403_vm8, %v401_v29, 0.0  ;;  %v454_v31 = vrot.slane %v420_v27, %v358_v6  ;;  %v450_v32 = vrot.slane %v417_v28, %v358_v6 }
  0xb3   : > { %405 = vadd.xlane.f32.xlu0 %v404_v30 }
  0xb4   : > { %v479_v36 = vsel %vm388_vm1, %v454_v31, %v450_v32 }
  0xb5   : > { %v423_v33 = vpop.xlane.xlu0 %422  ;;  %v426_v34 = vpop.xlane.xlu1 %425 }
  0xb6   : > { %v458_v35 = vrot.slane %v423_v33, %v358_v6  ;;  %v462_v37 = vrot.slane %v426_v34, %v358_v6 }
  0xb8   : > { %v480_v38 = vsel %vm390_vm2, %v458_v35, %v479_v36 }
  0xb9   : > { %v429_v39 = vpop.xlane.xlu0 %428  ;;  %v432_v40 = vpop.xlane.xlu1 %431  ;;  %v481_v42 = vsel %vm392_vm3, %v462_v37, %v480_v38 }
  0xba   : > { %v466_v41 = vrot.slane %v429_v39, %v358_v6  ;;  %v470_v43 = vrot.slane %v432_v40, %v358_v6 }
  0xbc   : > { %v482_v44 = vsel %vm394_vm4, %v466_v41, %v481_v42 }
  0xbd   : > { %v435_v45 = vpop.xlane.xlu0 %434  ;;  %v438_v46 = vpop.xlane.xlu1 %437  ;;  %v483_v49 = vsel %vm396_vm5, %v470_v43, %v482_v44 }
  0xbe   : > { %v474_v47 = vrot.slane %v435_v45, %v358_v6  ;;  %v478_v48 = vrot.slane %v438_v46, %v358_v6 }
  0xc0   : > { %v484_v50 = vsel %vm398_vm6, %v474_v47, %v483_v49 }
  0xc1   : > { %v485_v51 = vsel %vm400_vm7, %v478_v48, %v484_v50 }
  0xc2   : > { %v487_v52 = vsel %vm403_vm8, %v485_v51, 0.0 }
  0xc3   : > { %488 = vadd.xlane.f32.xlu1 %v487_v52 }
 0x140   : > { %v406_v53 = vpop.xlane.xlu0 %405 }
 0x141   : > { %495 = vst.msk [vmem:[%s279_s11] sm:$0xff] %vm493_vm9, %v406_v53  ;;  %v490_v54 = vmax.f32 %v406_v53, 1.0 }
 0x143   : > { %627 = vrcp.f32 %v490_v54 }
 0x14d   : > { %v628_v55 = vpop.eup %627 }
 0x150   : > { %v489_v56 = vpop.xlane.xlu1 %488 }
 0x151   : > { %v492_v57 = vmul.f32 %v628_v55, %v489_v56 }
 0x153   : > { %494 = vst.msk [vmem:[%s275_s14] sm:$0xff] %vm493_vm9, %v492_v57 }
 0x154 PF: > { %s16_s18 = sadd.s32 1, %s635_s18  }
 0x155   : > { %p13_p5 = scmp.ge.s32.totalorder %s16_s18, 4  }
 0x157   :  { %15 = sbr.rel (!%p13_p5) target bundleno = 1 (0x1), region = 84 }

</bundles_post_ra>
